<compile_context>
chip_gen: v6e
topology: v6e:2x2x1
jax: 0.10.0
libtpu: 0.0.40
codegen_flags: <defaults>
</compile_context>

<pallas_src>
import functools

import numpy as np
import jax
import jax.numpy as jnp
from jax.experimental import pallas as pl
from jax.experimental.pallas import tpu as pltpu

_TM = 512        # max output-row tile (sublane axis)
_MAX_TK = 2048   # max K per reduction step


def _round_up(x, m):
    return (x + m - 1) // m * m


# ---------------------------------------------------------------------------
# Pallas kernels
# ---------------------------------------------------------------------------
def _matmul_bias_act_kernel(p_ref, w_ref, b_ref, *rest, relu, has_res):
    """Tiled (tm,tk)@(tk,tn) MXU matmul with f32 VMEM accumulator.

    Epilogue (only on the last K step): folded-BN bias add, optional fused
    residual add, optional ReLU, cast to the (bf16) output dtype.
    """
    if has_res:
        id_ref, o_ref, acc_ref = rest
    else:
        o_ref, acc_ref = rest

    @pl.when(pl.program_id(2) == 0)
    def _init():
        acc_ref[...] = jnp.zeros_like(acc_ref)

    acc_ref[...] += jnp.dot(p_ref[...], w_ref[...],
                            preferred_element_type=jnp.float32)

    @pl.when(pl.program_id(2) == pl.num_programs(2) - 1)
    def _finalize():
        out = acc_ref[...] + b_ref[...]
        if has_res:
            out = out + id_ref[...].astype(jnp.float32)
        if relu:
            out = jnp.maximum(out, 0.0)
        o_ref[...] = out.astype(o_ref.dtype)


def _global_avgpool_kernel(x_ref, o_ref):
    # (B, H*W, tc) -> mean over spatial -> (B, tc), accumulate in f32.
    o_ref[...] = jnp.mean(x_ref[...].astype(jnp.float32), axis=1)


# ---------------------------------------------------------------------------
# Tiling policy
# ---------------------------------------------------------------------------
def _pick_tiles(M, K, N):
    """K is pre-aligned by the caller; N must be a multiple of 128."""
    tm = min(_TM, _round_up(M, 8))
    Mp = _round_up(M, tm)
    m_tiles = Mp // tm

    if N <= 128:
        tn = N
    elif m_tiles == 1:
        # Small-M layers: exactly 2 lane-dense N tiles -> minimal grid-step
        # overhead while still giving both v7x TensorCores an output tile.
        tn = N // 2 if (N // 2) % 128 == 0 else 128
    else:
        tn = 256 if N % 256 == 0 else 128

    if K <= _MAX_TK:
        tk, Kp = K, K                    # single reduction step
    else:
        tk = None
        for cand in range(_MAX_TK, 0, -128):      # largest 128-multiple divisor
            if K % cand == 0:
                tk = cand
                break
        if tk is None:
            Kp = _round_up(K, 128)
            for cand in range(_MAX_TK, 0, -128):
                if Kp % cand == 0:
                    tk = cand
                    break
        else:
            Kp = K
    return tm, tn, tk, Mp, Kp


# ---------------------------------------------------------------------------
# Fused conv(+folded BN)(+residual)(+ReLU) via im2col / reshape + gridded matmul
# ---------------------------------------------------------------------------
def _matmul_bias_act(patches, w2d, bias, identity, *, relu, align_k):
    M, K = patches.shape
    N = w2d.shape[1]
    Np = _round_up(N, 128)                 # lane-dense output stores
    Ka = _round_up(K, 128) if (align_k and K % 128 != 0) else K

    tm, tn, tk, Mp, Kp = _pick_tiles(M, Ka, Np)

    patches = patches.astype(jnp.bfloat16)
    w2d = w2d.astype(jnp.bfloat16)
    bias = bias.astype(jnp.float32)

    if Mp != M or Kp != K:
        patches = jnp.pad(patches, ((0, Mp - M), (0, Kp - K)))
    if Kp != K or Np != N:
        w2d = jnp.pad(w2d, ((0, Kp - K), (0, Np - N)))
    if Np != N:
        bias = jnp.pad(bias, (0, Np - N))
    bias2d = bias.reshape(1, Np)

    has_res = identity is not None
    args = [patches, w2d, bias2d]
    in_specs = [
        pl.BlockSpec((tm, tk), lambda i, j, k: (i, k)),
        # TODO(synk): pipeline_mode=pl.Buffered(3) on this spec once the
        # deeper-buffering path is validated on all target generations.
        pl.BlockSpec((tk, tn), lambda i, j, k: (k, j)),
        pl.BlockSpec((1, tn), lambda i, j, k: (0, j)),
    ]
    if has_res:
        ident = identity.astype(jnp.bfloat16)
        if Mp != M or Np != N:
            ident = jnp.pad(ident, ((0, Mp - M), (0, Np - N)))
        args.append(ident)
        in_specs.append(pl.BlockSpec((tm, tn), lambda i, j, k: (i, j)))

    out = pl.pallas_call(
        functools.partial(_matmul_bias_act_kernel, relu=relu, has_res=has_res),
        out_shape=jax.ShapeDtypeStruct((Mp, Np), jnp.bfloat16),
        grid=(Mp // tm, Np // tn, Kp // tk),
        in_specs=in_specs,
        out_specs=pl.BlockSpec((tm, tn), lambda i, j, k: (i, j)),
        scratch_shapes=[pltpu.VMEM((tm, tn), jnp.float32)],
        compiler_params=pltpu.CompilerParams(
            dimension_semantics=("parallel", "parallel", "arbitrary"),
            vmem_limit_bytes=32 * 1024 * 1024),
    )(*args)
    if Mp != M or Np != N:
        out = out[:M, :N]
    return out


def _im2col(x, kh, kw, stride, pad):
    # TODO(synk): replace with a direct conv (taps folded into the K grid axis
    # via manual DMA on the NHWC activation) to remove this HBM patch copy.
    B, H, W, C = x.shape
    xp = jnp.pad(x, ((0, 0), (pad, pad), (pad, pad), (0, 0)))
    Ho = (H + 2 * pad - kh) // stride + 1
    Wo = (W + 2 * pad - kw) // stride + 1
    cols = [xp[:, dy:dy + stride * Ho:stride, dx:dx + stride * Wo:stride, :]
            for dy in range(kh) for dx in range(kw)]
    patches = jnp.concatenate(cols, axis=-1)           # (B, Ho, Wo, kh*kw*C)
    return patches.reshape(B * Ho * Wo, kh * kw * C), Ho, Wo


@functools.partial(jax.jit, static_argnames=("stride", "pad", "relu"))
def conv_bn_act(x, w, bias, identity=None, *, stride, pad, relu):
    """Conv2d + folded BN (+ fused residual add) (+ ReLU) as a Pallas matmul."""
    kh, kw, cin, cout = w.shape
    B = x.shape[0]
    if kh == 1 and kw == 1:            # 1x1 conv: no im2col
        if stride != 1:
            # TODO(synk): express the stride in the patch index_map / manual
            # DMA instead of this XLA strided-slice copy (3 downsample convs).
            x = x[:, ::stride, ::stride, :]
        Ho, Wo = x.shape[1], x.shape[2]
        patches = x.reshape(B * Ho * Wo, cin)
        align_k = False
    else:
        patches, Ho, Wo = _im2col(x, kh, kw, stride, pad)
        align_k = True                 # pad K (e.g. stem 147 -> 256) for MXU
    id2d = None if identity is None else identity.reshape(B * Ho * Wo, cout)
    out = _matmul_bias_act(patches, w.reshape(kh * kw * cin, cout),
                           bias, id2d, relu=relu, align_k=align_k)
    return out.reshape(B, Ho, Wo, cout)


@jax.jit
def maxpool_3x3_s2_p1(x):
    # TODO(synk): overlapping 3x3/stride-2 windows are not expressible with
    # plain Blocked BlockSpecs; fused jnp running max (single pass, no 9x
    # stacked tensor).  Input is post-ReLU (>= 0) so zero padding == -inf pad.
    k, s, pad = 3, 2, 1
    B, H, W, C = x.shape
    Ho = (H + 2 * pad - k) // s + 1
    Wo = (W + 2 * pad - k) // s + 1
    xp = jnp.pad(x, ((0, 0), (pad, pad), (pad, pad), (0, 0)))
    out = None
    for dy in range(k):
        for dx in range(k):
            sl = xp[:, dy:dy + s * Ho:s, dx:dx + s * Wo:s, :]
            out = sl if out is None else jnp.maximum(out, sl)
    return out


@jax.jit
def global_avgpool(x):
    B, H, W, C = x.shape
    HW = H * W
    # Whole tensor in one grid step when small (always true after layer4);
    # channel-tiled fallback for huge inputs.
    if B * HW * C * x.dtype.itemsize <= (8 << 20):
        tc = C
    elif C % 256 == 0:
        tc = 256
    elif C % 128 == 0:
        tc = 128
    else:
        tc = C
    return pl.pallas_call(
        _global_avgpool_kernel,
        out_shape=jax.ShapeDtypeStruct((B, C), jnp.float32),
        grid=(C // tc,),
        in_specs=[pl.BlockSpec((B, HW, tc), lambda c: (0, 0, c))],
        out_specs=pl.BlockSpec((B, tc), lambda c: (0, c)),
        compiler_params=pltpu.CompilerParams(
            dimension_semantics=("arbitrary",)),
    )(x.reshape(B, HW, C))


# ---------------------------------------------------------------------------
# Deterministic synthetic parameters with ResNet-152 backbone shapes
# (pretrained-checkpoint loading replaced by He-style random init; eval-mode
#  BN with default running stats folded into the weights (scale) + bias).
# ---------------------------------------------------------------------------
def build_geo_embedding_params(key):
    n_convs = 1 + 4 + 3 * (3 + 8 + 36 + 3)          # stem + downsamples + blocks
    keys = iter(jax.random.split(key, n_convs))

    def conv(kh, kw, cin, cout, gamma=1.0):
        fan_in = kh * kw * cin
        w = jax.random.normal(next(keys), (kh, kw, cin, cout), jnp.float32)
        w = w * float(np.sqrt(2.0 / fan_in))
        # eval-mode BN with default running stats: scale = gamma/sqrt(var+eps),
        # bias = beta - mean*scale.  Fold the scale into the weights.
        scale = jnp.full((cout,), gamma, jnp.float32) / jnp.sqrt(1.0 + 1e-5)
        bias = jnp.zeros((cout,), jnp.float32)
        w = (w * scale[None, None, None, :]).astype(jnp.bfloat16)
        return (w, bias)

    params = {"stem": conv(7, 7, 3, 64)}
    layers = []
    in_ch = 64
    # ResNet-152 bottleneck config: [3, 8, 36, 3]
    for planes, n_blocks, stride in [(64, 3, 1), (128, 8, 2),
                                     (256, 36, 2), (512, 3, 2)]:
        out_ch = planes * 4
        blocks = []
        for i in range(n_blocks):
            blk_stride = stride if i == 0 else 1
            blk = {
                "stride": blk_stride,
                "conv1": conv(1, 1, in_ch, planes),
                "conv2": conv(3, 3, planes, planes),
                # small gamma on the last BN keeps the deep random stack finite
                "conv3": conv(1, 1, planes, out_ch, gamma=0.1),
            }
            if blk_stride != 1 or in_ch != out_ch:
                blk["down"] = conv(1, 1, in_ch, out_ch)
            blocks.append(blk)
            in_ch = out_ch
        layers.append(blocks)
    params["layers"] = layers
    return params


# ---------------------------------------------------------------------------
# Forward pass: backbone(x) -> flatten, exactly like the PyTorch module
# ---------------------------------------------------------------------------
def geo_embedding_forward(x_nchw, params):
    # PyTorch inputs are NCHW; convert once to NHWC bf16 for the TPU kernels.
    x = jnp.transpose(x_nchw, (0, 2, 3, 1)).astype(jnp.bfloat16)

    w, b = params["stem"]
    x = conv_bn_act(x, w, b, stride=2, pad=3, relu=True)     # conv1+bn1+relu
    x = maxpool_3x3_s2_p1(x)                                  # maxpool

    for blocks in params["layers"]:                           # layer1..layer4
        for blk in blocks:
            identity = x
            stride = blk["stride"]
            w, b = blk["conv1"]
            out = conv_bn_act(x, w, b, stride=1, pad=0, relu=True)
            w, b = blk["conv2"]
            out = conv_bn_act(out, w, b, stride=stride, pad=1, relu=True)
            if "down" in blk:
                w, b = blk["down"]
                identity = conv_bn_act(x, w, b, stride=stride, pad=0,
                                       relu=False)
            # conv3 + bn3 + residual add + relu, all fused in one kernel
            w, b = blk["conv3"]
            x = conv_bn_act(out, w, b, identity, stride=1, pad=0, relu=True)

    x = global_avgpool(x)              # AdaptiveAvgPool2d((1,1)) -> (B, 2048)
    return x                           # already flat == x.view(x.size(0), -1)


if __name__ == "__main__":
    key = jax.random.PRNGKey(0)
    pkey, xkey = jax.random.split(key)
    params = build_geo_embedding_params(pkey)

    # Small input consistent with the module: NCHW RGB image batch.
    x = jax.random.normal(xkey, (2, 3, 64, 64), jnp.float32)

    emb = geo_embedding_forward(x, params)
    emb = jax.block_until_ready(emb)

    assert emb.shape == (2, 2048), emb.shape
    assert bool(jnp.all(jnp.isfinite(emb)))
    print("KERNEL_OK")
</pallas_src>

<mosaic_0001>
module attributes {stable_mosaic.version = 11 : i64} {
  func.func @_matmul_bias_act_kernel(%arg0: i32, %arg1: i32, %arg2: i32, %arg3: memref<512x256xbf16, #tpu.memory_space<vmem>>, %arg4: memref<256x128xbf16, #tpu.memory_space<vmem>>, %arg5: memref<1x128xf32, #tpu.memory_space<vmem>>, %arg6: memref<512x128xbf16, #tpu.memory_space<vmem>>, %arg7: memref<512x128xf32, #tpu.memory_space<vmem>>) attributes {dimension_semantics = [#tpu.dimension_semantics<parallel>, #tpu.dimension_semantics<parallel>, #tpu.dimension_semantics<arbitrary>], iteration_bounds = array<i64: 4, 1, 1>, scalar_prefetch = 0 : i64, scratch_operands = 1 : i64, tpu.core_type = #tpu.core_type<tc>, window_params = [{transform_indices = @transform_0, window_bounds = array<i64: 512, 256>}, {transform_indices = @transform_1, window_bounds = array<i64: 256, 128>}, {transform_indices = @transform_2, window_bounds = array<i64: 1, 128>}, {transform_indices = @transform_3, window_bounds = array<i64: 512, 128>}]} {
    %c0_i32 = arith.constant 0 : i32
    %0 = arith.cmpi eq, %arg2, %c0_i32 : i32
    %1 = arith.extui %0 : i1 to i32
    %c0_i32_0 = arith.constant 0 : i32
    %2 = arith.cmpi ne, %1, %c0_i32_0 : i32
    scf.if %2 {
      %cst_10 = arith.constant 0.000000e+00 : f32
      %12 = vector.broadcast %cst_10 : f32 to vector<512x128xf32>
      %c0_11 = arith.constant 0 : index
      %c0_12 = arith.constant 0 : index
      %13 = vector.load %arg7[%c0_11, %c0_12] : memref<512x128xf32, #tpu.memory_space<vmem>>, vector<512x128xf32>
      tpu.vector_store %arg7[%c0_11, %c0_12], %12 {strides = array<i32>} : memref<512x128xf32, #tpu.memory_space<vmem>>, vector<512x128xf32>,
    } else {
    }
    %c0 = arith.constant 0 : index
    %c0_1 = arith.constant 0 : index
    %3 = vector.load %arg7[%c0, %c0_1] : memref<512x128xf32, #tpu.memory_space<vmem>>, vector<512x128xf32>
    %c0_2 = arith.constant 0 : index
    %c0_3 = arith.constant 0 : index
    %4 = vector.load %arg3[%c0_2, %c0_3] : memref<512x256xbf16, #tpu.memory_space<vmem>>, vector<512x256xbf16>
    %c0_4 = arith.constant 0 : index
    %c0_5 = arith.constant 0 : index
    %5 = vector.load %arg4[%c0_4, %c0_5] : memref<256x128xbf16, #tpu.memory_space<vmem>>, vector<256x128xbf16>
    %cst = arith.constant dense<0.000000e+00> : vector<512x128xf32>
    %6 = tpu.matmul %4, %5, %cst {dimension_numbers = #tpu.dot_dimension_numbers<[1], [0], [0], [1], [0, 0, 1, 1], [], []>} : vector<512x256xbf16>, vector<256x128xbf16>, vector<512x128xf32> -> vector<512x128xf32>
    %7 = arith.addf %3, %6 : vector<512x128xf32>
    %c0_6 = arith.constant 0 : index
    %c0_7 = arith.constant 0 : index
    %8 = vector.load %arg7[%c0_6, %c0_7] : memref<512x128xf32, #tpu.memory_space<vmem>>, vector<512x128xf32>
    tpu.vector_store %arg7[%c0_6, %c0_7], %7 {strides = array<i32>} : memref<512x128xf32, #tpu.memory_space<vmem>>, vector<512x128xf32>,
    %c0_i32_8 = arith.constant 0 : i32
    %9 = arith.cmpi eq, %arg2, %c0_i32_8 : i32
    %10 = arith.extui %9 : i1 to i32
    %c0_i32_9 = arith.constant 0 : i32
    %11 = arith.cmpi ne, %10, %c0_i32_9 : i32
    scf.if %11 {
      %c0_10 = arith.constant 0 : index
      %c0_11 = arith.constant 0 : index
      %12 = vector.load %arg7[%c0_10, %c0_11] : memref<512x128xf32, #tpu.memory_space<vmem>>, vector<512x128xf32>
      %c0_12 = arith.constant 0 : index
      %c0_13 = arith.constant 0 : index
      %13 = vector.load %arg5[%c0_12, %c0_13] : memref<1x128xf32, #tpu.memory_space<vmem>>, vector<1x128xf32>
      %14 = vector.broadcast %13 : vector<1x128xf32> to vector<512x128xf32>
      %15 = arith.addf %12, %14 : vector<512x128xf32>
      %cst_14 = arith.constant 0.000000e+00 : f32
      %16 = vector.broadcast %cst_14 : f32 to vector<512x128xf32>
      %17 = arith.maximumf %15, %16 : vector<512x128xf32>
      %18 = arith.truncf %17 : vector<512x128xf32> to vector<512x128xbf16>
      %c0_15 = arith.constant 0 : index
      %c0_16 = arith.constant 0 : index
      %19 = vector.load %arg6[%c0_15, %c0_16] : memref<512x128xbf16, #tpu.memory_space<vmem>>, vector<512x128xbf16>
      tpu.vector_store %arg6[%c0_15, %c0_16], %18 {strides = array<i32>} : memref<512x128xbf16, #tpu.memory_space<vmem>>, vector<512x128xbf16>,
    } else {
    }
    return
  }
  func.func @transform_0(%arg0: i32, %arg1: i32, %arg2: i32) -> (i32, i32) {
    %c0_i32 = arith.constant 0 : i32
    return %arg0, %arg2 : i32, i32
  }
  func.func @transform_1(%arg0: i32, %arg1: i32, %arg2: i32) -> (i32, i32) {
    %c0_i32 = arith.constant 0 : i32
    return %arg2, %arg1 : i32, i32
  }
  func.func @transform_2(%arg0: i32, %arg1: i32, %arg2: i32) -> (i32, i32) {
    %c0_i32 = arith.constant 0 : i32
    %c0_i32_0 = arith.constant 0 : i32
    return %c0_i32, %arg1 : i32, i32
  }
  func.func @transform_3(%arg0: i32, %arg1: i32, %arg2: i32) -> (i32, i32) {
    %c0_i32 = arith.constant 0 : i32
    return %arg0, %arg1 : i32, i32
  }
}

</mosaic_0001>

<bundles_post_ra>
// kernel: conv_bn_act.1
= control target key start
LH: loop header
LB: loop body
LE: loop exit
PB: predicated region body
PF: predicated region fallthrough
CT: control target
= control target key end

     0   :  { %8 = vsyncpa [#allocation4], 0  ;;  %s3058_s0 = inlined_call_operand.vmem [shape: bf16[2048,256], index: 0, kind: input, shape index: {}]   ;;  %s3059_s1 = inlined_call_operand.vmem [shape: bf16[256,128], index: 1, kind: input, shape index: {}]   ;;  %s3060_s2 = inlined_call_operand.vmem [shape: f32[1,128], index: 2, kind: input, shape index: {}]   ;;  %s3061_s3 = inlined_call_operand.hbm [shape: bf16[2048,128], index: 3, kind: output, shape index: {}]  }
   0x1   :  { %10 = vsyncpa [#allocation4 + $0x1], 0  ;;  %s2691_s12 = smov 0   ;;  %s2693_s13 = smov 0  }
   0x2   :  { %s2695_s14 = smov 0   ;;  %s2697_s15 = smov 0  }
   0x3   :  { %s2699_s16 = smov 0   ;;  %s2701_s17 = smov 0  }
   0x4 LB: > { %s1969_s18 = sadd.s32 4294967295, %s2665_s17   ;;  %s1970_s19 = sadd.s32 4294967294, %s2665_s17   ;;  %s2665_s17 = sphi %s2701_s17, %s16_s17   ;;  %s2661_s16 = sphi %s2699_s16, %s3068_s16   ;;  %s2657_s15 = sphi %s2697_s15, %s3067_s15   ;;  %s2653_s14 = sphi %s2695_s14, %s3066_s14   ;;  %s2649_s13 = sphi %s2693_s13, %s3065_s13   ;;  %s2645_s12 = sphi %s2691_s12, %s3064_s12  }
   0x5   : > { %s35_s20 = sadd.s32 1, %s2661_s16  ;;  %s126_s21 = sadd.s32 1, %s2653_s14 }
   0x6   : > { %p37_p0 = scmp.ge.s32.totalorder %s35_s20, 4  ;;  %p136_p1 = scmp.ne.s32.totalorder %s2653_s14, %s2649_s13 }
   0x7   : > { %p137_p2 = scmp.eq.s32.totalorder %s1969_s18, 3  ;;  %p142_p3 = scmp.ne.s32.totalorder %s2649_s13, %s2645_s12 }
   0x8   : > { %s3070_s20 = smov (%p37_p0, %s35_s20), 0  ;;  %p143_p5 = scmp.eq.s32.totalorder %s1970_s19, 3 }
   0x9   : > { %p2731_p4 = por %p137_p2, %p136_p1  ;;  %s121_s23 = ssub.s32 %s2661_s16, %s3070_s20 }
   0xa   : > { %p1975_p6 = scmp.ge.s32.totalorder %s2665_s17, 1  ;;  %p124_p7 = scmp.eq.s32.totalorder %s121_s23, 0 }
   0xb   : > { %p2738_p8 = por %p143_p5, %p142_p3  ;;  %p194_p9 = scmp.lt.s32.totalorder %s2665_s17, 5 }
   0xc   : > { %s2744_s25 = scalar_select %p124_p7, %s2653_s14, %s126_s21  }
   0xd   : > { %p195_p10 = pnand %p1975_p6, %p194_p9 }
   0xe   : > { %s1977_s28 = sshll.u32 (!%p195_p10), %s2657_s15, 6  ;;  %s231_s5 = sand.u32 (!%p195_p10), 1, %s2649_s13  }
   0xf   : > { %198 = sbr.rel (%p195_p10) target bundleno = 422 (0x1a6), region = 32  ;;  %p236_p11 = scmp.lt.s32.totalorder (!%p195_p10), %s1977_s28, 255 }
  0x10   : > { %s2195_s7 = sshll.u32 (!%p195_p10), %s2657_s15, 12  ;;  %s3013_s15 = scalar_lea.sflag (!%p195_p10), [#allocation4], %s231_s5 }
  0x11   : > { %s3005_s11 = scalar_lea.hbm (!%p195_p10), %s3061_s3, %s2195_s7  ;;  %s2668_s21 = smov (!%p195_p10), [#allocation3]  }
  0x12   : > { %s2593_s23 = sshll.u32 (!%p195_p10), %s2668_s21, 4  ;;  %s2594_s23 = int_to_ptr.vmem [resolvable:$false] %s2593_s23 }
  0x13   : > { %s2595_s26 = scalar_lea.vmem (!%p195_p10), %s2594_s23, 8192 }
  0x14   : > { %v2477_v0 = vld [vmem:[%s3059_s1 + $0x38] sm:$0xff]   ;;  %v2667_v1 = vmov 0   ;;  %v2478_v2 = vld [vmem:[%s3059_s1 + $0x30] sm:$0xff]   ;;  %v2479_v3 = vld [vmem:[%s3059_s1 + $0x28] sm:$0xff]   ;;  %s3072_s28 = smov (!%p236_p11, %s1977_s28), 255 }
  0x15   : > { %904 = vmatprep.subr.bf16.mxu0 %v2667_v1  ;;  %2387 = vmatprep.subr.bf16.mxu1 %v2667_v1  ;;  %v2480_v4 = vld [vmem:[%s3059_s1 + $0x20] sm:$0xff]   ;;  %s2130_s8 = sshll.u32 %s3072_s28, 3  ;;  %v2481_v5 = vld [vmem:[%s3059_s1 + $0x18] sm:$0xff]   ;;  %v2482_v7 = vld [vmem:[%s3059_s1 + $0x10] sm:$0xff]  }
  0x16   : > { %905 = vmatpush1.bf16.msra.mxu0 %v2477_v0  ;;  %2403 = vmatpush1.bf16.msra.mxu1 %v2477_v0  ;;  %s2773_s19 = scalar_lea.vmem %s3058_s0, %s2130_s8  ;;  %v2483_v9 = vld [vmem:[%s3059_s1 + $0x8] sm:$0xff]   ;;  %v2484_v10 = vld [vmem:[%s3059_s1] sm:$0xff]   ;;  %v2485_v11 = vld [vmem:[%s3059_s1 + $0x78] sm:$0xff]  }
  0x17   : > { %906 = vmatprep.subr.bf16.mxu0 %v2667_v1  ;;  %2388 = vmatprep.subr.bf16.mxu1 %v2667_v1  ;;  %v2495_v6 = vld [vmem:[%s2773_s19 + $0x4] ss:$8 sps:$4 sm:$0xff]   ;;  %v2486_v12 = vld [vmem:[%s3059_s1 + $0x70] sm:$0xff]   ;;  %v2489_v15 = vld [vmem:[%s3059_s1 + $0x58] sm:$0xff]  }
  0x18   : > { %v2498_v8 = vld [vmem:[%s2773_s19 + $0x104] ss:$8 sps:$4 sm:$0xff]   ;;  %936 = vmatprep.mubr.bf16.mxu0 %v2495_v6  ;;  %v2490_v16 = vld [vmem:[%s3059_s1 + $0x50] sm:$0xff]   ;;  %v2493_v19 = vld [vmem:[%s2773_s19] ss:$8 sps:$4 sm:$0xff]  }
  0x19   : > { %1064 = vmatprep.mubr.bf16.mxu1 %v2498_v8  ;;  %v2487_v13 = vld [vmem:[%s3059_s1 + $0x68] sm:$0xff]   ;;  %v2488_v14 = vld [vmem:[%s3059_s1 + $0x60] sm:$0xff]   ;;  %v2499_v21 = vld [vmem:[%s2773_s19 + $0x14] ss:$8 sps:$4 sm:$0xff]  }
  0x1a   : > { %907 = vmatpush1.bf16.msra.mxu0 %v2478_v2  ;;  %2404 = vmatpush1.bf16.msra.mxu1 %v2478_v2  ;;  %v2491_v17 = vld [vmem:[%s3059_s1 + $0x48] sm:$0xff]   ;;  %v2492_v18 = vld [vmem:[%s3059_s1 + $0x40] sm:$0xff]   ;;  %v2501_v22 = vld [vmem:[%s2773_s19 + $0x114] ss:$8 sps:$4 sm:$0xff]  }
  0x1b   : > { %908 = vmatprep.subr.bf16.mxu0 %v2667_v1  ;;  %2389 = vmatprep.subr.bf16.mxu1 %v2667_v1  ;;  %v2496_v20 = vld [vmem:[%s2773_s19 + $0x100] ss:$8 sps:$4 sm:$0xff]   ;;  %v2503_v23 = vld [vmem:[%s2773_s19 + $0x10] ss:$8 sps:$4 sm:$0xff]   ;;  %v2505_v25 = vld [vmem:[%s2773_s19 + $0x24] ss:$8 sps:$4 sm:$0xff]  }
  0x1c   : > { %v2504_v24 = vld [vmem:[%s2773_s19 + $0x110] ss:$8 sps:$4 sm:$0xff]   ;;  %v2507_v26 = vld [vmem:[%s2773_s19 + $0x124] ss:$8 sps:$4 sm:$0xff]   ;;  %v2509_v27 = vld [vmem:[%s2773_s19 + $0x20] ss:$8 sps:$4 sm:$0xff]  }
  0x1d   : > { %v2510_v28 = vld [vmem:[%s2773_s19 + $0x120] ss:$8 sps:$4 sm:$0xff]   ;;  %v2511_v29 = vld [vmem:[%s2773_s19 + $0x34] ss:$8 sps:$4 sm:$0xff]   ;;  %v2515_v31 = vld [vmem:[%s2773_s19 + $0x30] ss:$8 sps:$4 sm:$0xff]  }
  0x1e   : > { %909 = vmatpush1.bf16.msra.mxu0 %v2479_v3  ;;  %2405 = vmatpush1.bf16.msra.mxu1 %v2479_v3  ;;  %v2513_v30 = vld [vmem:[%s2773_s19 + $0x134] ss:$8 sps:$4 sm:$0xff]   ;;  %v2516_v32 = vld [vmem:[%s2773_s19 + $0x130] ss:$8 sps:$4 sm:$0xff]   ;;  %v2517_v33 = vld [vmem:[%s2773_s19 + $0x44] ss:$8 sps:$4 sm:$0xff]  }
  0x1f   : > { %910 = vmatprep.subr.bf16.mxu0 %v2667_v1  ;;  %2390 = vmatprep.subr.bf16.mxu1 %v2667_v1  ;;  %v2519_v34 = vld [vmem:[%s2773_s19 + $0x144] ss:$8 sps:$4 sm:$0xff]   ;;  %v2521_v35 = vld [vmem:[%s2773_s19 + $0x40] ss:$8 sps:$4 sm:$0xff]   ;;  %v2523_v37 = vld [vmem:[%s2773_s19 + $0x54] ss:$8 sps:$4 sm:$0xff]  }
  0x20   : > { %v2522_v36 = vld [vmem:[%s2773_s19 + $0x140] ss:$8 sps:$4 sm:$0xff]   ;;  %v2525_v38 = vld [vmem:[%s2773_s19 + $0x154] ss:$8 sps:$4 sm:$0xff]   ;;  %v2527_v39 = vld [vmem:[%s2773_s19 + $0x50] ss:$8 sps:$4 sm:$0xff]  }
  0x21   : > { %v2528_v40 = vld [vmem:[%s2773_s19 + $0x150] ss:$8 sps:$4 sm:$0xff]   ;;  %v2529_v41 = vld [vmem:[%s2773_s19 + $0x64] ss:$8 sps:$4 sm:$0xff]   ;;  %v2533_v43 = vld [vmem:[%s2773_s19 + $0x60] ss:$8 sps:$4 sm:$0xff]  }
  0x22   : > { %911 = vmatpush1.bf16.msra.mxu0 %v2480_v4  ;;  %2406 = vmatpush1.bf16.msra.mxu1 %v2480_v4  ;;  %v2531_v42 = vld [vmem:[%s2773_s19 + $0x164] ss:$8 sps:$4 sm:$0xff]   ;;  %v2534_v44 = vld [vmem:[%s2773_s19 + $0x160] ss:$8 sps:$4 sm:$0xff]   ;;  %v2535_v45 = vld [vmem:[%s2773_s19 + $0x74] ss:$8 sps:$4 sm:$0xff]  }
  0x23   : > { %912 = vmatprep.subr.bf16.mxu0 %v2667_v1  ;;  %2391 = vmatprep.subr.bf16.mxu1 %v2667_v1  ;;  %v2537_v46 = vld [vmem:[%s2773_s19 + $0x174] ss:$8 sps:$4 sm:$0xff]   ;;  %v2539_v47 = vld [vmem:[%s2773_s19 + $0x70] ss:$8 sps:$4 sm:$0xff]   ;;  %v2541_v49 = vld [vmem:[%s2773_s19 + $0x84] ss:$8 sps:$4 sm:$0xff]  }
  0x24   : > { %v2540_v48 = vld [vmem:[%s2773_s19 + $0x170] ss:$8 sps:$4 sm:$0xff]   ;;  %v2543_v50 = vld [vmem:[%s2773_s19 + $0x184] ss:$8 sps:$4 sm:$0xff]   ;;  %v2545_v51 = vld [vmem:[%s2773_s19 + $0x80] ss:$8 sps:$4 sm:$0xff]  }
  0x25   : > { %v2546_v52 = vld [vmem:[%s2773_s19 + $0x180] ss:$8 sps:$4 sm:$0xff]   ;;  %v2547_v53 = vld [vmem:[%s2773_s19 + $0x94] ss:$8 sps:$4 sm:$0xff]   ;;  %v2551_v55 = vld [vmem:[%s2773_s19 + $0x90] ss:$8 sps:$4 sm:$0xff]  }
  0x26   : > { %913 = vmatpush1.bf16.msra.mxu0 %v2481_v5  ;;  %2407 = vmatpush1.bf16.msra.mxu1 %v2481_v5  ;;  %v2549_v54 = vld [vmem:[%s2773_s19 + $0x194] ss:$8 sps:$4 sm:$0xff]   ;;  %v2552_v56 = vld [vmem:[%s2773_s19 + $0x190] ss:$8 sps:$4 sm:$0xff]   ;;  %v2553_v57 = vld [vmem:[%s2773_s19 + $0xa4] ss:$8 sps:$4 sm:$0xff]  }
  0x27   : > { %914 = vmatprep.subr.bf16.mxu0 %v2667_v1  ;;  %2392 = vmatprep.subr.bf16.mxu1 %v2667_v1  ;;  %v2555_v58 = vld [vmem:[%s2773_s19 + $0x1a4] ss:$8 sps:$4 sm:$0xff]   ;;  %v2557_v59 = vld [vmem:[%s2773_s19 + $0xa0] ss:$8 sps:$4 sm:$0xff]   ;;  %v2559_v61 = vld [vmem:[%s2773_s19 + $0xb4] ss:$8 sps:$4 sm:$0xff]  }
  0x28   : > { %v2558_v60 = vld [vmem:[%s2773_s19 + $0x1a0] ss:$8 sps:$4 sm:$0xff]   ;;  %v2561_v62 = vld [vmem:[%s2773_s19 + $0x1b4] ss:$8 sps:$4 sm:$0xff]   ;;  %v2563_v63 = vld [vmem:[%s2773_s19 + $0xb0] ss:$8 sps:$4 sm:$0xff]  }
  0x29   : > { %v2564_v0 = vld [vmem:[%s2773_s19 + $0x1b0] ss:$8 sps:$4 sm:$0xff]   ;;  %v2567_v2 = vld [vmem:[%s2773_s19 + $0x1c4] ss:$8 sps:$4 sm:$0xff]   ;;  %v2569_v3 = vld [vmem:[%s2773_s19 + $0xc0] ss:$8 sps:$4 sm:$0xff]  }
  0x2a   : > { %915 = vmatpush1.bf16.msra.mxu0 %v2482_v7  ;;  %2408 = vmatpush1.bf16.msra.mxu1 %v2482_v7  ;;  %v2570_v4 = vld [vmem:[%s2773_s19 + $0x1c0] ss:$8 sps:$4 sm:$0xff]   ;;  %v2571_v5 = vld [vmem:[%s2773_s19 + $0xd4] ss:$8 sps:$4 sm:$0xff]   ;;  %v2575_v7 = vld [vmem:[%s2773_s19 + $0xd0] ss:$8 sps:$4 sm:$0xff]  }
  0x2b   : > { %916 = vmatprep.subr.bf16.mxu0 %v2667_v1  ;;  %2393 = vmatprep.subr.bf16.mxu1 %v2667_v1  ;;  %v2573_v6 = vld [vmem:[%s2773_s19 + $0x1d4] ss:$8 sps:$4 sm:$0xff]   ;;  %v2576_v8 = vld [vmem:[%s2773_s19 + $0x1d0] ss:$8 sps:$4 sm:$0xff]  }
  0x2e   : > { %917 = vmatpush1.bf16.msra.mxu0 %v2483_v9  ;;  %2409 = vmatpush1.bf16.msra.mxu1 %v2483_v9  ;;  %v2577_v9 = vld [vmem:[%s2773_s19 + $0xe4] ss:$8 sps:$4 sm:$0xff]  }
  0x2f   : > { %918 = vmatprep.subr.bf16.mxu0 %v2667_v1  ;;  %2394 = vmatprep.subr.bf16.mxu1 %v2667_v1 }
  0x32   : > { %919 = vmatpush1.bf16.msra.mxu0 %v2484_v10  ;;  %2410 = vmatpush1.bf16.msra.mxu1 %v2484_v10  ;;  %v2579_v10 = vld [vmem:[%s2773_s19 + $0x1e4] ss:$8 sps:$4 sm:$0xff]  }
  0x33   : > { %920 = vmatprep.subr.bf16.mxu0 %v2667_v1  ;;  %2395 = vmatprep.subr.bf16.mxu1 %v2667_v1 }
  0x36   : > { %921 = vmatpush2.bf16.msra.mxu0 %v2485_v11  ;;  %2411 = vmatpush2.bf16.msra.mxu1 %v2485_v11  ;;  %v2581_v11 = vld [vmem:[%s2773_s19 + $0xe0] ss:$8 sps:$4 sm:$0xff]  }
  0x37   : > { %922 = vmatprep.subr.bf16.mxu0 %v2667_v1  ;;  %2396 = vmatprep.subr.bf16.mxu1 %v2667_v1 }
  0x3a   : > { %923 = vmatpush2.bf16.msra.mxu0 %v2486_v12  ;;  %2412 = vmatpush2.bf16.msra.mxu1 %v2486_v12  ;;  %v2582_v12 = vld [vmem:[%s2773_s19 + $0x1e0] ss:$8 sps:$4 sm:$0xff]  }
  0x3b   : > { %924 = vmatprep.subr.bf16.mxu0 %v2667_v1  ;;  %2397 = vmatprep.subr.bf16.mxu1 %v2667_v1 }
  0x3e   : > { %925 = vmatpush2.bf16.msra.mxu0 %v2487_v13  ;;  %2413 = vmatpush2.bf16.msra.mxu1 %v2487_v13  ;;  %v2583_v13 = vld [vmem:[%s2773_s19 + $0xf4] ss:$8 sps:$4 sm:$0xff]  }
  0x3f   : > { %926 = vmatprep.subr.bf16.mxu0 %v2667_v1  ;;  %2398 = vmatprep.subr.bf16.mxu1 %v2667_v1 }
  0x42   : > { %927 = vmatpush2.bf16.msra.mxu0 %v2488_v14  ;;  %2414 = vmatpush2.bf16.msra.mxu1 %v2488_v14  ;;  %v2585_v14 = vld [vmem:[%s2773_s19 + $0x1f4] ss:$8 sps:$4 sm:$0xff]  }
  0x43   : > { %928 = vmatprep.subr.bf16.mxu0 %v2667_v1  ;;  %2399 = vmatprep.subr.bf16.mxu1 %v2667_v1 }
  0x46   : > { %929 = vmatpush2.bf16.msra.mxu0 %v2489_v15  ;;  %2415 = vmatpush2.bf16.msra.mxu1 %v2489_v15  ;;  %v2587_v15 = vld [vmem:[%s2773_s19 + $0xf0] ss:$8 sps:$4 sm:$0xff]  }
  0x47   : > { %930 = vmatprep.subr.bf16.mxu0 %v2667_v1  ;;  %2400 = vmatprep.subr.bf16.mxu1 %v2667_v1 }
  0x4a   : > { %931 = vmatpush2.bf16.msra.mxu0 %v2490_v16  ;;  %2416 = vmatpush2.bf16.msra.mxu1 %v2490_v16  ;;  %v2588_v16 = vld [vmem:[%s2773_s19 + $0x1f0] ss:$8 sps:$4 sm:$0xff]  }
  0x4b   : > { %932 = vmatprep.subr.bf16.mxu0 %v2667_v1  ;;  %2401 = vmatprep.subr.bf16.mxu1 %v2667_v1 }
  0x4e   : > { %933 = vmatpush2.bf16.msra.mxu0 %v2491_v17  ;;  %2417 = vmatpush2.bf16.msra.mxu1 %v2491_v17 }
  0x4f   : > { %934 = vmatprep.subr.bf16.mxu0 %v2667_v1  ;;  %2402 = vmatprep.subr.bf16.mxu1 %v2667_v1  ;;  %v2565_v1 = vld [vmem:[%s2773_s19 + $0xc4] ss:$8 sps:$4 sm:$0xff]   ;;  %s1976_s19 = sshll.u32 %s231_s5, 8 }
  0x50   : > { %s2908_s6 = scalar_lea.vmem [#allocation3], %s1976_s19 }
  0x51   : > { %s1858_s8 = sshll.u32 %s2908_s6, 4  ;;  %s3007_s8 = int_to_ptr.vmem [resolvable:$true] %s1858_s8 }
  0x52   : > { %935 = vmatpush2.bf16.msra.mxu0 %v2492_v18  ;;  %2418 = vmatpush2.bf16.msra.mxu1 %v2492_v18  ;;  %v2899_v18 = vld [vmem:[%s3060_s2] ss:$0 sm:$0xff]  ;;  %s2589_s18 = scalar_lea.vmem %s3007_s8, 4096  ;;  %p2596_p1 = scmp.lt.s32.totalorder %s3007_s8, %s2594_s23 }
  0x53   : > { %p2590_p12 = scmp.ne.s32.totalorder %s3007_s8, %s2589_s18  ;;  %p2597_p2 = scmp.lt.s32.totalorder %s2595_s26, %s2589_s18 }
  0x55   : > { %937 = vmatmul.mubr.bf16.vlgmr.msra.gmra.mxu0 %v2493_v19  ;;  %1065 = vmatmul.mubr.bf16.vlgmr.msra.gmra.mxu1 %v2496_v20  ;;  %p2591_p13 = pnand %p2590_p12, %p2731_p4  ;;  %p2598_p3 = por %p2597_p2, %p2596_p1 }
  0x56   : > { %944 = vmatprep.mubr.bf16.mxu0 %v2499_v21  ;;  %1072 = vmatprep.mubr.bf16.mxu1 %v2501_v22 }
  0x57   : > { %p2592_p0 = pneg %p2591_p13 }
  0x59   : > { %p2599_p5 = pnand %p2598_p3, %p2592_p0 }
  0x5d   : > { %945 = vmatmul.mubr.bf16.gmra.mxu0 %v2503_v23  ;;  %1073 = vmatmul.mubr.bf16.gmra.mxu1 %v2504_v24 }
  0x5e   : > { %952 = vmatprep.mubr.bf16.mxu0 %v2505_v25  ;;  %1080 = vmatprep.mubr.bf16.mxu1 %v2507_v26 }
  0x65   : > { %953 = vmatmul.mubr.bf16.gmra.mxu0 %v2509_v27  ;;  %1081 = vmatmul.mubr.bf16.gmra.mxu1 %v2510_v28 }
  0x66   : > { %960 = vmatprep.mubr.bf16.mxu0 %v2511_v29  ;;  %1088 = vmatprep.mubr.bf16.mxu1 %v2513_v30 }
  0x6d   : > { %961 = vmatmul.mubr.bf16.gmra.mxu0 %v2515_v31  ;;  %1089 = vmatmul.mubr.bf16.gmra.mxu1 %v2516_v32 }
  0x6e   : > { %968 = vmatprep.mubr.bf16.mxu0 %v2517_v33  ;;  %1096 = vmatprep.mubr.bf16.mxu1 %v2519_v34 }
  0x75   : > { %969 = vmatmul.mubr.bf16.gmra.mxu0 %v2521_v35  ;;  %1097 = vmatmul.mubr.bf16.gmra.mxu1 %v2522_v36 }
  0x76   : > { %976 = vmatprep.mubr.bf16.mxu0 %v2523_v37  ;;  %1104 = vmatprep.mubr.bf16.mxu1 %v2525_v38 }
  0x7d   : > { %977 = vmatmul.mubr.bf16.gmra.mxu0 %v2527_v39  ;;  %1105 = vmatmul.mubr.bf16.gmra.mxu1 %v2528_v40 }
  0x7e   : > { %984 = vmatprep.mubr.bf16.mxu0 %v2529_v41  ;;  %1112 = vmatprep.mubr.bf16.mxu1 %v2531_v42 }
  0x85   : > { %985 = vmatmul.mubr.bf16.gmra.mxu0 %v2533_v43  ;;  %1113 = vmatmul.mubr.bf16.gmra.mxu1 %v2534_v44 }
  0x86   : > { %992 = vmatprep.mubr.bf16.mxu0 %v2535_v45  ;;  %1120 = vmatprep.mubr.bf16.mxu1 %v2537_v46 }
  0x8d   : > { %993 = vmatmul.mubr.bf16.gmra.mxu0 %v2539_v47  ;;  %1121 = vmatmul.mubr.bf16.gmra.mxu1 %v2540_v48 }
  0x8e   : > { %1000 = vmatprep.mubr.bf16.mxu0 %v2541_v49  ;;  %1128 = vmatprep.mubr.bf16.mxu1 %v2543_v50 }
  0x95   : > { %1001 = vmatmul.mubr.bf16.gmra.mxu0 %v2545_v51  ;;  %1129 = vmatmul.mubr.bf16.gmra.mxu1 %v2546_v52 }
  0x96   : > { %1008 = vmatprep.mubr.bf16.mxu0 %v2547_v53  ;;  %1136 = vmatprep.mubr.bf16.mxu1 %v2549_v54 }
  0x9d   : > { %1009 = vmatmul.mubr.bf16.gmra.mxu0 %v2551_v55  ;;  %1137 = vmatmul.mubr.bf16.gmra.mxu1 %v2552_v56 }
  0x9e   : > { %1016 = vmatprep.mubr.bf16.mxu0 %v2553_v57  ;;  %1144 = vmatprep.mubr.bf16.mxu1 %v2555_v58 }
  0xa5   : > { %1017 = vmatmul.mubr.bf16.gmra.mxu0 %v2557_v59  ;;  %1145 = vmatmul.mubr.bf16.gmra.mxu1 %v2558_v60 }
  0xa6   : > { %1024 = vmatprep.mubr.bf16.mxu0 %v2559_v61  ;;  %1152 = vmatprep.mubr.bf16.mxu1 %v2561_v62 }
  0xad   : > { %1025 = vmatmul.mubr.bf16.gmra.mxu0 %v2563_v63  ;;  %1153 = vmatmul.mubr.bf16.gmra.mxu1 %v2564_v0 }
  0xae   : > { %1032 = vmatprep.mubr.bf16.mxu0 %v2565_v1  ;;  %1160 = vmatprep.mubr.bf16.mxu1 %v2567_v2 }
  0xb5   : > { %1033 = vmatmul.mubr.bf16.gmra.mxu0 %v2569_v3  ;;  %1161 = vmatmul.mubr.bf16.gmra.mxu1 %v2570_v4 }
  0xb6   : > { %1040 = vmatprep.mubr.bf16.mxu0 %v2571_v5  ;;  %1168 = vmatprep.mubr.bf16.mxu1 %v2573_v6 }
  0xbd   : > { %1041 = vmatmul.mubr.bf16.gmra.mxu0 %v2575_v7  ;;  %1169 = vmatmul.mubr.bf16.gmra.mxu1 %v2576_v8 }
  0xbe   : > { %1048 = vmatprep.mubr.bf16.mxu0 %v2577_v9  ;;  %1176 = vmatprep.mubr.bf16.mxu1 %v2579_v10 }
  0xc5   : > { %1049 = vmatmul.mubr.bf16.gmra.mxu0 %v2581_v11  ;;  %1177 = vmatmul.mubr.bf16.gmra.mxu1 %v2582_v12 }
  0xc6   : > { %1056 = vmatprep.mubr.bf16.mxu0 %v2583_v13  ;;  %1184 = vmatprep.mubr.bf16.mxu1 %v2585_v14 }
  0xcd   : > { %1057 = vmatmul.mubr.bf16.gmra.mxu0 %v2587_v15  ;;  %1185 = vmatmul.mubr.bf16.gmra.mxu1 %v2588_v16 }
 0x115   : > { %v938_v17 = vpop.f32.mrf.mxu0  ;;  %v1066_v19 = vpop.f32.mrf.mxu1 }
 0x116   : > { %v1395_v22 = vadd.f32 %v2899_v18, %v938_v17  ;;  %v1427_v23 = vadd.f32 %v2899_v18, %v1066_v19 }
 0x117   : > { %v940_v20 = vpop.f32.mrf.mxu0  ;;  %v1068_v21 = vpop.f32.mrf.mxu1 }
 0x118   : > { %v1459_v30 = vmax.f32 %v1395_v22, 0.0  ;;  %v1491_v31 = vmax.f32 %v1427_v23, 0.0 }
 0x119   : > { %v941_v24 = vpop.f32.mrf.mxu0  ;;  %v1069_v25 = vpop.f32.mrf.mxu1 }
 0x11a   : > { %v1396_v26 = vadd.f32 %v2899_v18, %v941_v24  ;;  %v1428_v27 = vadd.f32 %v2899_v18, %v1069_v25 }
 0x11b   : > { %v943_v28 = vpop.f32.mrf.mxu0  ;;  %v1071_v29 = vpop.f32.mrf.mxu1 }
 0x11c   : > { %v1460_v32 = vmax.f32 %v1396_v26, 0.0  ;;  %v1492_v33 = vmax.f32 %v1428_v27, 0.0 }
 0x11d   : > { %v946_v34 = vpop.f32.mrf.mxu0  ;;  %v1074_v35 = vpop.f32.mrf.mxu1 }
 0x11e   : > { %v2199_v36 = vpack.c.bf16 %v1460_v32, %v1459_v30  ;;  %v2279_v37 = vpack.c.bf16 %v1492_v33, %v1491_v31  ;;  %v1397_v40 = vadd.f32 %v2899_v18, %v946_v34  ;;  %v1429_v41 = vadd.f32 %v2899_v18, %v1074_v35 }
 0x11f   : > { %v948_v38 = vpop.f32.mrf.mxu0  ;;  %v1076_v39 = vpop.f32.mrf.mxu1 }
 0x120   : > { %2200 = vst [vmem:[%s2908_s6] sm:$0xff] %v2199_v36   ;;  %2371 = vst [vmem:[%s2908_s6 + $0x80] sm:$0xff] %v2279_v37   ;;  %v1461_v48 = vmax.f32 %v1397_v40, 0.0  ;;  %v1493_v49 = vmax.f32 %v1429_v41, 0.0 }
 0x121   : > { %v949_v42 = vpop.f32.mrf.mxu0  ;;  %v1077_v43 = vpop.f32.mrf.mxu1 }
 0x122   : > { %v1398_v44 = vadd.f32 %v2899_v18, %v949_v42  ;;  %v1430_v45 = vadd.f32 %v2899_v18, %v1077_v43 }
 0x123   : > { %v951_v46 = vpop.f32.mrf.mxu0  ;;  %v1079_v47 = vpop.f32.mrf.mxu1 }
 0x124   : > { %v1462_v50 = vmax.f32 %v1398_v44, 0.0  ;;  %v1494_v51 = vmax.f32 %v1430_v45, 0.0 }
 0x125   : > { %v954_v52 = vpop.f32.mrf.mxu0  ;;  %v1082_v53 = vpop.f32.mrf.mxu1 }
 0x126   : > { %v2204_v54 = vpack.c.bf16 %v1462_v50, %v1461_v48  ;;  %v2284_v55 = vpack.c.bf16 %v1494_v51, %v1493_v49  ;;  %v1399_v58 = vadd.f32 %v2899_v18, %v954_v52  ;;  %v1431_v59 = vadd.f32 %v2899_v18, %v1082_v53 }
 0x127   : > { %v956_v56 = vpop.f32.mrf.mxu0  ;;  %v1084_v57 = vpop.f32.mrf.mxu1 }
 0x128   : > { %2356 = vst [vmem:[%s2908_s6 + $0x8] sm:$0xff] %v2204_v54   ;;  %2372 = vst [vmem:[%s2908_s6 + $0x88] sm:$0xff] %v2284_v55   ;;  %v1463_v2 = vmax.f32 %v1399_v58, 0.0  ;;  %v1495_v3 = vmax.f32 %v1431_v59, 0.0 }
 0x129   : > { %v957_v60 = vpop.f32.mrf.mxu0  ;;  %v1085_v61 = vpop.f32.mrf.mxu1 }
 0x12a   : > { %v1400_v62 = vadd.f32 %v2899_v18, %v957_v60  ;;  %v1432_v63 = vadd.f32 %v2899_v18, %v1085_v61 }
 0x12b   : > { %v959_v0 = vpop.f32.mrf.mxu0  ;;  %v1087_v1 = vpop.f32.mrf.mxu1 }
 0x12c   : > { %v1464_v4 = vmax.f32 %v1400_v62, 0.0  ;;  %v1496_v5 = vmax.f32 %v1432_v63, 0.0 }
 0x12d   : > { %v962_v6 = vpop.f32.mrf.mxu0  ;;  %v1090_v7 = vpop.f32.mrf.mxu1 }
 0x12e   : > { %v2209_v8 = vpack.c.bf16 %v1464_v4, %v1463_v2  ;;  %v2289_v9 = vpack.c.bf16 %v1496_v5, %v1495_v3  ;;  %v1401_v12 = vadd.f32 %v2899_v18, %v962_v6  ;;  %v1433_v13 = vadd.f32 %v2899_v18, %v1090_v7 }
 0x12f   : > { %v964_v10 = vpop.f32.mrf.mxu0  ;;  %v1092_v11 = vpop.f32.mrf.mxu1 }
 0x130   : > { %2357 = vst [vmem:[%s2908_s6 + $0x10] sm:$0xff] %v2209_v8   ;;  %2373 = vst [vmem:[%s2908_s6 + $0x90] sm:$0xff] %v2289_v9   ;;  %v1465_v21 = vmax.f32 %v1401_v12, 0.0  ;;  %v1497_v22 = vmax.f32 %v1433_v13, 0.0 }
 0x131   : > { %v965_v14 = vpop.f32.mrf.mxu0  ;;  %v1093_v15 = vpop.f32.mrf.mxu1 }
 0x132   : > { %v1402_v16 = vadd.f32 %v2899_v18, %v965_v14  ;;  %v1434_v17 = vadd.f32 %v2899_v18, %v1093_v15 }
 0x133   : > { %v967_v19 = vpop.f32.mrf.mxu0  ;;  %v1095_v20 = vpop.f32.mrf.mxu1 }
 0x134   : > { %v1466_v23 = vmax.f32 %v1402_v16, 0.0  ;;  %v1498_v24 = vmax.f32 %v1434_v17, 0.0 }
 0x135   : > { %v970_v25 = vpop.f32.mrf.mxu0  ;;  %v1098_v26 = vpop.f32.mrf.mxu1 }
 0x136   : > { %v2214_v27 = vpack.c.bf16 %v1466_v23, %v1465_v21  ;;  %v2294_v28 = vpack.c.bf16 %v1498_v24, %v1497_v22  ;;  %v1403_v31 = vadd.f32 %v2899_v18, %v970_v25  ;;  %v1435_v32 = vadd.f32 %v2899_v18, %v1098_v26 }
 0x137   : > { %v972_v29 = vpop.f32.mrf.mxu0  ;;  %v1100_v30 = vpop.f32.mrf.mxu1 }
 0x138   : > { %2358 = vst [vmem:[%s2908_s6 + $0x18] sm:$0xff] %v2214_v27   ;;  %2374 = vst [vmem:[%s2908_s6 + $0x98] sm:$0xff] %v2294_v28   ;;  %v1467_v39 = vmax.f32 %v1403_v31, 0.0  ;;  %v1499_v40 = vmax.f32 %v1435_v32, 0.0 }
 0x139   : > { %v973_v33 = vpop.f32.mrf.mxu0  ;;  %v1101_v34 = vpop.f32.mrf.mxu1 }
 0x13a   : > { %v1404_v35 = vadd.f32 %v2899_v18, %v973_v33  ;;  %v1436_v36 = vadd.f32 %v2899_v18, %v1101_v34 }
 0x13b   : > { %v975_v37 = vpop.f32.mrf.mxu0  ;;  %v1103_v38 = vpop.f32.mrf.mxu1 }
 0x13c   : > { %v1468_v41 = vmax.f32 %v1404_v35, 0.0  ;;  %v1500_v42 = vmax.f32 %v1436_v36, 0.0 }
 0x13d   : > { %v978_v43 = vpop.f32.mrf.mxu0  ;;  %v1106_v44 = vpop.f32.mrf.mxu1 }
 0x13e   : > { %v2219_v45 = vpack.c.bf16 %v1468_v41, %v1467_v39  ;;  %v2299_v46 = vpack.c.bf16 %v1500_v42, %v1499_v40  ;;  %v1405_v49 = vadd.f32 %v2899_v18, %v978_v43  ;;  %v1437_v50 = vadd.f32 %v2899_v18, %v1106_v44 }
 0x13f   : > { %v980_v47 = vpop.f32.mrf.mxu0  ;;  %v1108_v48 = vpop.f32.mrf.mxu1 }
 0x140   : > { %2359 = vst [vmem:[%s2908_s6 + $0x20] sm:$0xff] %v2219_v45   ;;  %2375 = vst [vmem:[%s2908_s6 + $0xa0] sm:$0xff] %v2299_v46   ;;  %v1469_v57 = vmax.f32 %v1405_v49, 0.0  ;;  %v1501_v58 = vmax.f32 %v1437_v50, 0.0 }
 0x141   : > { %v981_v51 = vpop.f32.mrf.mxu0  ;;  %v1109_v52 = vpop.f32.mrf.mxu1 }
 0x142   : > { %v1406_v53 = vadd.f32 %v2899_v18, %v981_v51  ;;  %v1438_v54 = vadd.f32 %v2899_v18, %v1109_v52 }
 0x143   : > { %v983_v55 = vpop.f32.mrf.mxu0  ;;  %v1111_v56 = vpop.f32.mrf.mxu1 }
 0x144   : > { %v1470_v59 = vmax.f32 %v1406_v53, 0.0  ;;  %v1502_v60 = vmax.f32 %v1438_v54, 0.0 }
 0x145   : > { %v986_v61 = vpop.f32.mrf.mxu0  ;;  %v1114_v62 = vpop.f32.mrf.mxu1 }
 0x146   : > { %v2224_v63 = vpack.c.bf16 %v1470_v59, %v1469_v57  ;;  %v2304_v0 = vpack.c.bf16 %v1502_v60, %v1501_v58  ;;  %v1407_v3 = vadd.f32 %v2899_v18, %v986_v61  ;;  %v1439_v4 = vadd.f32 %v2899_v18, %v1114_v62 }
 0x147   : > { %v988_v1 = vpop.f32.mrf.mxu0  ;;  %v1116_v2 = vpop.f32.mrf.mxu1 }
 0x148   : > { %2360 = vst [vmem:[%s2908_s6 + $0x28] sm:$0xff] %v2224_v63   ;;  %2376 = vst [vmem:[%s2908_s6 + $0xa8] sm:$0xff] %v2304_v0   ;;  %v1471_v11 = vmax.f32 %v1407_v3, 0.0  ;;  %v1503_v12 = vmax.f32 %v1439_v4, 0.0 }
 0x149   : > { %v989_v5 = vpop.f32.mrf.mxu0  ;;  %v1117_v6 = vpop.f32.mrf.mxu1 }
 0x14a   : > { %v1408_v7 = vadd.f32 %v2899_v18, %v989_v5  ;;  %v1440_v8 = vadd.f32 %v2899_v18, %v1117_v6 }
 0x14b   : > { %v991_v9 = vpop.f32.mrf.mxu0  ;;  %v1119_v10 = vpop.f32.mrf.mxu1 }
 0x14c   : > { %v1472_v13 = vmax.f32 %v1408_v7, 0.0  ;;  %v1504_v14 = vmax.f32 %v1440_v8, 0.0 }
 0x14d   : > { %v994_v15 = vpop.f32.mrf.mxu0  ;;  %v1122_v16 = vpop.f32.mrf.mxu1 }
 0x14e   : > { %v2229_v17 = vpack.c.bf16 %v1472_v13, %v1471_v11  ;;  %v2309_v19 = vpack.c.bf16 %v1504_v14, %v1503_v12  ;;  %v1409_v22 = vadd.f32 %v2899_v18, %v994_v15  ;;  %v1441_v23 = vadd.f32 %v2899_v18, %v1122_v16 }
 0x14f   : > { %v996_v20 = vpop.f32.mrf.mxu0  ;;  %v1124_v21 = vpop.f32.mrf.mxu1 }
 0x150   : > { %2361 = vst [vmem:[%s2908_s6 + $0x30] sm:$0xff] %v2229_v17   ;;  %2377 = vst [vmem:[%s2908_s6 + $0xb0] sm:$0xff] %v2309_v19   ;;  %v1473_v30 = vmax.f32 %v1409_v22, 0.0  ;;  %v1505_v31 = vmax.f32 %v1441_v23, 0.0 }
 0x151   : > { %v997_v24 = vpop.f32.mrf.mxu0  ;;  %v1125_v25 = vpop.f32.mrf.mxu1 }
 0x152   : > { %v1410_v26 = vadd.f32 %v2899_v18, %v997_v24  ;;  %v1442_v27 = vadd.f32 %v2899_v18, %v1125_v25 }
 0x153   : > { %v999_v28 = vpop.f32.mrf.mxu0  ;;  %v1127_v29 = vpop.f32.mrf.mxu1 }
 0x154   : > { %v1474_v32 = vmax.f32 %v1410_v26, 0.0  ;;  %v1506_v33 = vmax.f32 %v1442_v27, 0.0 }
 0x155   : > { %v1002_v34 = vpop.f32.mrf.mxu0  ;;  %v1130_v35 = vpop.f32.mrf.mxu1 }
 0x156   : > { %v2234_v36 = vpack.c.bf16 %v1474_v32, %v1473_v30  ;;  %v2314_v37 = vpack.c.bf16 %v1506_v33, %v1505_v31  ;;  %v1411_v40 = vadd.f32 %v2899_v18, %v1002_v34  ;;  %v1443_v41 = vadd.f32 %v2899_v18, %v1130_v35 }
 0x157   : > { %v1004_v38 = vpop.f32.mrf.mxu0  ;;  %v1132_v39 = vpop.f32.mrf.mxu1 }
 0x158   : > { %2362 = vst [vmem:[%s2908_s6 + $0x38] sm:$0xff] %v2234_v36   ;;  %2378 = vst [vmem:[%s2908_s6 + $0xb8] sm:$0xff] %v2314_v37   ;;  %v1475_v48 = vmax.f32 %v1411_v40, 0.0  ;;  %v1507_v49 = vmax.f32 %v1443_v41, 0.0 }
 0x159   : > { %v1005_v42 = vpop.f32.mrf.mxu0  ;;  %v1133_v43 = vpop.f32.mrf.mxu1 }
 0x15a   : > { %v1412_v44 = vadd.f32 %v2899_v18, %v1005_v42  ;;  %v1444_v45 = vadd.f32 %v2899_v18, %v1133_v43 }
 0x15b   : > { %v1007_v46 = vpop.f32.mrf.mxu0  ;;  %v1135_v47 = vpop.f32.mrf.mxu1 }
 0x15c   : > { %v1476_v50 = vmax.f32 %v1412_v44, 0.0  ;;  %v1508_v51 = vmax.f32 %v1444_v45, 0.0 }
 0x15d   : > { %v1010_v52 = vpop.f32.mrf.mxu0  ;;  %v1138_v53 = vpop.f32.mrf.mxu1 }
 0x15e   : > { %v2239_v54 = vpack.c.bf16 %v1476_v50, %v1475_v48  ;;  %v2319_v55 = vpack.c.bf16 %v1508_v51, %v1507_v49  ;;  %v1413_v58 = vadd.f32 %v2899_v18, %v1010_v52  ;;  %v1445_v59 = vadd.f32 %v2899_v18, %v1138_v53 }
 0x15f   : > { %v1012_v56 = vpop.f32.mrf.mxu0  ;;  %v1140_v57 = vpop.f32.mrf.mxu1 }
 0x160   : > { %2363 = vst [vmem:[%s2908_s6 + $0x40] sm:$0xff] %v2239_v54   ;;  %2379 = vst [vmem:[%s2908_s6 + $0xc0] sm:$0xff] %v2319_v55   ;;  %v1477_v2 = vmax.f32 %v1413_v58, 0.0  ;;  %v1509_v3 = vmax.f32 %v1445_v59, 0.0 }
 0x161   : > { %v1013_v60 = vpop.f32.mrf.mxu0  ;;  %v1141_v61 = vpop.f32.mrf.mxu1 }
 0x162   : > { %v1414_v62 = vadd.f32 %v2899_v18, %v1013_v60  ;;  %v1446_v63 = vadd.f32 %v2899_v18, %v1141_v61 }
 0x163   : > { %v1015_v0 = vpop.f32.mrf.mxu0  ;;  %v1143_v1 = vpop.f32.mrf.mxu1 }
 0x164   : > { %v1478_v4 = vmax.f32 %v1414_v62, 0.0  ;;  %v1510_v5 = vmax.f32 %v1446_v63, 0.0 }
 0x165   : > { %v1018_v6 = vpop.f32.mrf.mxu0  ;;  %v1146_v7 = vpop.f32.mrf.mxu1 }
 0x166   : > { %v2244_v8 = vpack.c.bf16 %v1478_v4, %v1477_v2  ;;  %v2324_v9 = vpack.c.bf16 %v1510_v5, %v1509_v3  ;;  %v1415_v12 = vadd.f32 %v2899_v18, %v1018_v6  ;;  %v1447_v13 = vadd.f32 %v2899_v18, %v1146_v7 }
 0x167   : > { %v1020_v10 = vpop.f32.mrf.mxu0  ;;  %v1148_v11 = vpop.f32.mrf.mxu1 }
 0x168   : > { %2364 = vst [vmem:[%s2908_s6 + $0x48] sm:$0xff] %v2244_v8   ;;  %2380 = vst [vmem:[%s2908_s6 + $0xc8] sm:$0xff] %v2324_v9   ;;  %v1479_v21 = vmax.f32 %v1415_v12, 0.0  ;;  %v1511_v22 = vmax.f32 %v1447_v13, 0.0 }
 0x169   : > { %v1021_v14 = vpop.f32.mrf.mxu0  ;;  %v1149_v15 = vpop.f32.mrf.mxu1 }
 0x16a   : > { %v1416_v16 = vadd.f32 %v2899_v18, %v1021_v14  ;;  %v1448_v17 = vadd.f32 %v2899_v18, %v1149_v15 }
 0x16b   : > { %v1023_v19 = vpop.f32.mrf.mxu0  ;;  %v1151_v20 = vpop.f32.mrf.mxu1 }
 0x16c   : > { %v1480_v23 = vmax.f32 %v1416_v16, 0.0  ;;  %v1512_v24 = vmax.f32 %v1448_v17, 0.0 }
 0x16d   : > { %v1026_v25 = vpop.f32.mrf.mxu0  ;;  %v1154_v26 = vpop.f32.mrf.mxu1 }
 0x16e   : > { %v2249_v27 = vpack.c.bf16 %v1480_v23, %v1479_v21  ;;  %v2329_v28 = vpack.c.bf16 %v1512_v24, %v1511_v22  ;;  %v1417_v31 = vadd.f32 %v2899_v18, %v1026_v25  ;;  %v1449_v32 = vadd.f32 %v2899_v18, %v1154_v26 }
 0x16f   : > { %v1028_v29 = vpop.f32.mrf.mxu0  ;;  %v1156_v30 = vpop.f32.mrf.mxu1 }
 0x170   : > { %2365 = vst [vmem:[%s2908_s6 + $0x50] sm:$0xff] %v2249_v27   ;;  %2381 = vst [vmem:[%s2908_s6 + $0xd0] sm:$0xff] %v2329_v28   ;;  %v1481_v39 = vmax.f32 %v1417_v31, 0.0  ;;  %v1513_v40 = vmax.f32 %v1449_v32, 0.0 }
 0x171   : > { %v1029_v33 = vpop.f32.mrf.mxu0  ;;  %v1157_v34 = vpop.f32.mrf.mxu1 }
 0x172   : > { %v1418_v35 = vadd.f32 %v2899_v18, %v1029_v33  ;;  %v1450_v36 = vadd.f32 %v2899_v18, %v1157_v34 }
 0x173   : > { %v1031_v37 = vpop.f32.mrf.mxu0  ;;  %v1159_v38 = vpop.f32.mrf.mxu1 }
 0x174   : > { %v1482_v41 = vmax.f32 %v1418_v35, 0.0  ;;  %v1514_v42 = vmax.f32 %v1450_v36, 0.0 }
 0x175   : > { %v1034_v43 = vpop.f32.mrf.mxu0  ;;  %v1162_v44 = vpop.f32.mrf.mxu1 }
 0x176   : > { %v2254_v45 = vpack.c.bf16 %v1482_v41, %v1481_v39  ;;  %v2334_v46 = vpack.c.bf16 %v1514_v42, %v1513_v40  ;;  %v1419_v49 = vadd.f32 %v2899_v18, %v1034_v43  ;;  %v1451_v50 = vadd.f32 %v2899_v18, %v1162_v44 }
 0x177   : > { %v1036_v47 = vpop.f32.mrf.mxu0  ;;  %v1164_v48 = vpop.f32.mrf.mxu1 }
 0x178   : > { %2366 = vst [vmem:[%s2908_s6 + $0x58] sm:$0xff] %v2254_v45   ;;  %2382 = vst [vmem:[%s2908_s6 + $0xd8] sm:$0xff] %v2334_v46   ;;  %v1483_v57 = vmax.f32 %v1419_v49, 0.0  ;;  %v1515_v58 = vmax.f32 %v1451_v50, 0.0 }
 0x179   : > { %v1037_v51 = vpop.f32.mrf.mxu0  ;;  %v1165_v52 = vpop.f32.mrf.mxu1 }
 0x17a   : > { %v1420_v53 = vadd.f32 %v2899_v18, %v1037_v51  ;;  %v1452_v54 = vadd.f32 %v2899_v18, %v1165_v52 }
 0x17b   : > { %v1039_v55 = vpop.f32.mrf.mxu0  ;;  %v1167_v56 = vpop.f32.mrf.mxu1 }
 0x17c   : > { %v1484_v59 = vmax.f32 %v1420_v53, 0.0  ;;  %v1516_v60 = vmax.f32 %v1452_v54, 0.0 }
 0x17d   : > { %v1042_v61 = vpop.f32.mrf.mxu0  ;;  %v1170_v62 = vpop.f32.mrf.mxu1 }
 0x17e   : > { %v2259_v63 = vpack.c.bf16 %v1484_v59, %v1483_v57  ;;  %v2339_v0 = vpack.c.bf16 %v1516_v60, %v1515_v58  ;;  %v1421_v3 = vadd.f32 %v2899_v18, %v1042_v61  ;;  %v1453_v4 = vadd.f32 %v2899_v18, %v1170_v62 }
 0x17f   : > { %v1044_v1 = vpop.f32.mrf.mxu0  ;;  %v1172_v2 = vpop.f32.mrf.mxu1 }
 0x180   : > { %2367 = vst [vmem:[%s2908_s6 + $0x60] sm:$0xff] %v2259_v63   ;;  %2383 = vst [vmem:[%s2908_s6 + $0xe0] sm:$0xff] %v2339_v0   ;;  %v1485_v11 = vmax.f32 %v1421_v3, 0.0  ;;  %v1517_v12 = vmax.f32 %v1453_v4, 0.0 }
 0x181   : > { %v1045_v5 = vpop.f32.mrf.mxu0  ;;  %v1173_v6 = vpop.f32.mrf.mxu1 }
 0x182   : > { %v1422_v7 = vadd.f32 %v2899_v18, %v1045_v5  ;;  %v1454_v8 = vadd.f32 %v2899_v18, %v1173_v6 }
 0x183   : > { %v1047_v9 = vpop.f32.mrf.mxu0  ;;  %v1175_v10 = vpop.f32.mrf.mxu1 }
 0x184   : > { %v1486_v13 = vmax.f32 %v1422_v7, 0.0  ;;  %v1518_v14 = vmax.f32 %v1454_v8, 0.0 }
 0x185   : > { %v1050_v15 = vpop.f32.mrf.mxu0  ;;  %v1178_v16 = vpop.f32.mrf.mxu1 }
 0x186   : > { %v2264_v17 = vpack.c.bf16 %v1486_v13, %v1485_v11  ;;  %v2344_v19 = vpack.c.bf16 %v1518_v14, %v1517_v12  ;;  %v1423_v22 = vadd.f32 %v2899_v18, %v1050_v15  ;;  %v1455_v23 = vadd.f32 %v2899_v18, %v1178_v16 }
 0x187   : > { %v1052_v20 = vpop.f32.mrf.mxu0  ;;  %v1180_v21 = vpop.f32.mrf.mxu1 }
 0x188   : > { %2368 = vst [vmem:[%s2908_s6 + $0x68] sm:$0xff] %v2264_v17   ;;  %2384 = vst [vmem:[%s2908_s6 + $0xe8] sm:$0xff] %v2344_v19   ;;  %v1487_v30 = vmax.f32 %v1423_v22, 0.0  ;;  %v1519_v31 = vmax.f32 %v1455_v23, 0.0 }
 0x189   : > { %v1053_v24 = vpop.f32.mrf.mxu0  ;;  %v1181_v25 = vpop.f32.mrf.mxu1 }
 0x18a   : > { %v1424_v26 = vadd.f32 %v2899_v18, %v1053_v24  ;;  %v1456_v27 = vadd.f32 %v2899_v18, %v1181_v25 }
 0x18b   : > { %v1055_v28 = vpop.f32.mrf.mxu0  ;;  %v1183_v29 = vpop.f32.mrf.mxu1 }
 0x18c   : > { %v1488_v32 = vmax.f32 %v1424_v26, 0.0  ;;  %v1520_v33 = vmax.f32 %v1456_v27, 0.0 }
 0x18d   : > { %v1058_v34 = vpop.f32.mrf.mxu0  ;;  %v1186_v35 = vpop.f32.mrf.mxu1 }
 0x18e   : > { %v2269_v36 = vpack.c.bf16 %v1488_v32, %v1487_v30  ;;  %v2349_v37 = vpack.c.bf16 %v1520_v33, %v1519_v31  ;;  %v1425_v40 = vadd.f32 %v2899_v18, %v1058_v34  ;;  %v1457_v41 = vadd.f32 %v2899_v18, %v1186_v35 }
 0x18f   : > { %v1060_v38 = vpop.f32.mrf.mxu0  ;;  %v1188_v39 = vpop.f32.mrf.mxu1 }
 0x190   : > { %2369 = vst [vmem:[%s2908_s6 + $0x70] sm:$0xff] %v2269_v36   ;;  %2385 = vst [vmem:[%s2908_s6 + $0xf0] sm:$0xff] %v2349_v37   ;;  %v1489_v48 = vmax.f32 %v1425_v40, 0.0  ;;  %v1521_v49 = vmax.f32 %v1457_v41, 0.0 }
 0x191   : > { %v1061_v42 = vpop.f32.mrf.mxu0  ;;  %v1189_v43 = vpop.f32.mrf.mxu1 }
 0x192   : > { %v1426_v44 = vadd.f32 %v2899_v18, %v1061_v42  ;;  %v1458_v45 = vadd.f32 %v2899_v18, %v1189_v43 }
 0x193   : > { %v1063_v46 = vpop.f32.mrf.mxu0  ;;  %v1191_v47 = vpop.f32.mrf.mxu1 }
 0x194   : > { %v1490_v50 = vmax.f32 %v1426_v44, 0.0  ;;  %v1522_v51 = vmax.f32 %v1458_v45, 0.0 }
 0x196   : > { %v2274_v18 = vpack.c.bf16 %v1490_v50, %v1489_v48  ;;  %v2354_v52 = vpack.c.bf16 %v1522_v51, %v1521_v49 }
 0x198   : > { %2370 = vst [vmem:[%s2908_s6 + $0x78] sm:$0xff] %v2274_v18   ;;  %2386 = vst [vmem:[%s2908_s6 + $0xf8] sm:$0xff] %v2354_v52  }
 0x199   : > { %2602 = shalt.err (!%p2599_p5)
}
 0x19a   : > { %s2603_s27 = scalar_lea.hbm %s3005_s11, 4096  ;;  %s2607_s30 = scalar_lea.hbm %s3061_s3, 16384 }
 0x19b   : > { %p2604_p6 = scmp.ne.s32.totalorder %s3005_s11, %s2603_s27  ;;  %p2608_p10 = scmp.lt.s32.totalorder %s3005_s11, %s3061_s3 }
 0x19c   : > { %p2609_p11 = scmp.lt.s32.totalorder %s2607_s30, %s2603_s27 }
 0x19d   : > { %p2605_p7 = pnand %p2604_p6, %p2731_p4 }
 0x19e   : > { %p2610_p12 = por %p2609_p11, %p2608_p10 }
 0x19f   : > { %p2606_p9 = pneg %p2605_p7 }
 0x1a1   : > { %p2611_p13 = pnand %p2610_p12, %p2606_p9 }
 0x1a3   : > { %2614 = shalt.err (!%p2611_p13)
}
 0x1a4   : > { %s2669_s19 = smov 64   ;;  %s2670_s6 = smov 4  }
 0x1a5   : > { %2419 = dma.vmem_to_hbm [thread:$0]  (%p2731_p4), %s3007_s8, 4096, %s3005_s11, %s3013_s15, %s2669_s19, %s2669_s19, %s2670_s6  }
 0x1a6 PF: > { %p2425_p0 = scmp.ge.s32.totalorder %s2665_s17, 2  ;;  %s1873_s7 = sand.u32 1, %s2645_s12  }
 0x1a7   : > { %s1874_s9 = scalar_lea.sflag [#allocation4], %s1873_s7 }
 0x1a8   : > { %p2422_p1 = pnand %p2425_p0, %p2738_p8 }
 0x1aa   : > { %p2423_p2 = pneg %p2422_p1 }
 0x1ac   : > { %2640 = dma.done.wait (%p2423_p2), %s1874_s9, 4096  }
 0x1ad   : > { %2642 = vsyncadd (%p2423_p2), %s1874_s9, 4294963200  ;;  %s16_s17 = sadd.s32 1, %s2665_s17   ;;  %s3064_s12 = smov %s2649_s13 }
 0x1ae   : > { %p13_p3 = scmp.ge.s32.totalorder %s16_s17, 6   ;;  %s3065_s13 = smov %s2653_s14 }
 0x1af   : > { %s3066_s14 = smov %s2744_s25  ;;  %s3067_s15 = smov %s2661_s16 }
 0x1b0   : > { %s3068_s16 = smov %s3070_s20  ;;  %15 = sbr.rel (!%p13_p3) target bundleno = 4 (0x4), region = 81 }
 0x1b5   :  { %1879 = vsyncpa [#allocation4], 1 }
 0x1b6   :  { %1881 = vsyncpa [#allocation4 + $0x1], 1 }

</bundles_post_ra>
